<compile_context>
chip_gen: v7x
topology: tpu7x:2x2x1
jax: 0.10.0
libtpu: 0.0.40
codegen_flags: <defaults>
</compile_context>

<pallas_src>
import functools

import jax
import jax.numpy as jnp
from jax.experimental import pallas as pl
from jax.experimental.pallas import tpu as pltpu

NEG_SLOPE = 0.01          # torch.nn.LeakyReLU default negative_slope
LANE = 128                # vreg lane width / MXU-friendly feature multiple
DEFAULT_TILE_B = 512      # large row tile to amortize grid-step overhead


def _round_up(n, m):
    return ((n + m - 1) // m) * m


def _leaky_relu(x):
    return jnp.where(x > 0, x, NEG_SLOPE * x)


def mlp_kernel(x_ref, w1_ref, b1_ref, w2_ref, b2_ref, w3_ref, b3_ref, o_ref):
    # x_ref: (TILE_B, IN_P)  -- already f32, no redundant cast.
    h = jnp.dot(x_ref[...], w1_ref[...], preferred_element_type=jnp.float32)
    h = _leaky_relu(h + b1_ref[...])

    h = jnp.dot(h, w2_ref[...], preferred_element_type=jnp.float32)
    h = _leaky_relu(h + b2_ref[...])

    out = jnp.dot(h, w3_ref[...], preferred_element_type=jnp.float32) + b3_ref[...]
    o_ref[...] = out.astype(o_ref.dtype)  # lane-dense (padded-to-128) store


@functools.partial(jax.jit, static_argnames=("tile_b",))
def mlp_forward(x, params, *, tile_b=DEFAULT_TILE_B):
    """x: (B, input_size) float32. params: dict of transposed weights / biases."""
    w1, b1 = params["w1"], params["b1"]
    w2, b2 = params["w2"], params["b2"]
    w3, b3 = params["w3"], params["b3"]

    B, in_size = x.shape
    hid_size = w1.shape[1]
    out_size = w3.shape[1]

    # Lane-dense padded feature sizes (zero padding keeps the math exact).
    in_p = _round_up(in_size, LANE)
    hid_p = _round_up(hid_size, LANE)
    out_p = _round_up(out_size, LANE)

    # Batch tile: multiple of 8 sublanes; pad batch up to a tile multiple.
    b_tile = min(tile_b, _round_up(B, 8))
    b_pad = _round_up(B, b_tile)

    f32 = jnp.float32
    x_p = jnp.zeros((b_pad, in_p), f32).at[:B, :in_size].set(x)
    w1_p = jnp.zeros((in_p, hid_p), f32).at[:in_size, :hid_size].set(w1)
    b1_p = jnp.zeros((1, hid_p), f32).at[:, :hid_size].set(b1)
    w2_p = jnp.zeros((hid_p, hid_p), f32).at[:hid_size, :hid_size].set(w2)
    b2_p = jnp.zeros((1, hid_p), f32).at[:, :hid_size].set(b2)
    w3_p = jnp.zeros((hid_p, out_p), f32).at[:hid_size, :out_size].set(w3)
    b3_p = jnp.zeros((1, out_p), f32).at[:, :out_size].set(b3)

    grid = (b_pad // b_tile,)

    # Activations are tiled over the batch grid; weights/biases use a constant
    # index_map so they are loaded once and stay resident in VMEM.
    x_spec = pl.BlockSpec((b_tile, in_p), lambda i: (i, 0))
    o_spec = pl.BlockSpec((b_tile, out_p), lambda i: (i, 0))
    w1_spec = pl.BlockSpec((in_p, hid_p), lambda i: (0, 0))
    b1_spec = pl.BlockSpec((1, hid_p), lambda i: (0, 0))
    w2_spec = pl.BlockSpec((hid_p, hid_p), lambda i: (0, 0))
    b2_spec = pl.BlockSpec((1, hid_p), lambda i: (0, 0))
    w3_spec = pl.BlockSpec((hid_p, out_p), lambda i: (0, 0))
    b3_spec = pl.BlockSpec((1, out_p), lambda i: (0, 0))

    out_padded = pl.pallas_call(
        mlp_kernel,
        out_shape=jax.ShapeDtypeStruct((b_pad, out_p), jnp.float32),
        grid=grid,
        in_specs=[x_spec, w1_spec, b1_spec, w2_spec, b2_spec, w3_spec, b3_spec],
        out_specs=o_spec,
        compiler_params=pltpu.CompilerParams(
            dimension_semantics=("parallel",),   # megacore-shardable on v7x
            vmem_limit_bytes=32 * 1024 * 1024,   # explicit; safe on v5e/v6e/v7x
        ),
    )(x_p, w1_p, b1_p, w2_p, b2_p, w3_p, b3_p)

    return out_padded[:B, :out_size]


def init_params(key, input_size, hidden_size, output_size):
    """Deterministic init mimicking torch.nn.Linear (U(-1/sqrt(fan_in), +1/sqrt(fan_in))).
    Weights are stored as (in_features, out_features)."""
    ks = jax.random.split(key, 6)

    def linear(kw, kb, fan_in, fan_out):
        bound = 1.0 / jnp.sqrt(jnp.float32(fan_in))
        w = jax.random.uniform(kw, (fan_in, fan_out), jnp.float32, -bound, bound)
        b = jax.random.uniform(kb, (1, fan_out), jnp.float32, -bound, bound)
        return w, b

    w1, b1 = linear(ks[0], ks[1], input_size, hidden_size)
    w2, b2 = linear(ks[2], ks[3], hidden_size, hidden_size)
    w3, b3 = linear(ks[4], ks[5], hidden_size, output_size)
    return {"w1": w1, "b1": b1, "w2": w2, "b2": b2, "w3": w3, "b3": b3}


def mlp_reference(x, p):
    h = _leaky_relu(x @ p["w1"] + p["b1"])
    h = _leaky_relu(h @ p["w2"] + p["b2"])
    return h @ p["w3"] + p["b3"]


if __name__ == "__main__":
    # Module constants: hidden_size = 100, output_size = 25.
    # input_size depends on the (absent) dataset; pick a small value.
    hidden_size = 100
    output_size = 25
    input_size = 32

    key = jax.random.PRNGKey(0)
    kx, kp, kx2 = jax.random.split(key, 3)
    params = init_params(kp, input_size, hidden_size, output_size)

    # Small-shape check (single grid step).
    batch = 8
    x = jax.random.normal(kx, (batch, input_size), jnp.float32)
    out = mlp_forward(x, params)
    jax.block_until_ready(out)
    ref = mlp_reference(x, params)
    assert out.shape == (batch, output_size)
    assert jnp.allclose(out, ref, atol=1e-4, rtol=1e-4)

    # Multi-tile check (grid > 1, batch not a tile multiple) exercises the
    # batch pipeline + padding path.
    batch2 = 300
    x2 = jax.random.normal(kx2, (batch2, input_size), jnp.float32)
    out2 = mlp_forward(x2, params, tile_b=128)
    jax.block_until_ready(out2)
    ref2 = mlp_reference(x2, params)
    assert out2.shape == (batch2, output_size)
    assert jnp.allclose(out2, ref2, atol=1e-4, rtol=1e-4)

    print("KERNEL_OK")
</pallas_src>

<mosaic_0001>
module attributes {stable_mosaic.version = 11 : i64} {
  func.func @mlp_kernel(%arg0: i32, %arg1: memref<8x128xf32, #tpu.memory_space<vmem>>, %arg2: memref<128x128xf32, #tpu.memory_space<vmem>>, %arg3: memref<1x128xf32, #tpu.memory_space<vmem>>, %arg4: memref<128x128xf32, #tpu.memory_space<vmem>>, %arg5: memref<1x128xf32, #tpu.memory_space<vmem>>, %arg6: memref<128x128xf32, #tpu.memory_space<vmem>>, %arg7: memref<1x128xf32, #tpu.memory_space<vmem>>, %arg8: memref<8x128xf32, #tpu.memory_space<vmem>>) attributes {dimension_semantics = [#tpu.dimension_semantics<parallel>], iteration_bounds = array<i64: 1>, scalar_prefetch = 0 : i64, scratch_operands = 0 : i64, tpu.core_type = #tpu.core_type<tc>, window_params = [{transform_indices = @transform_0, window_bounds = array<i64: 8, 128>}, {pipeline_mode = #tpu.pipeline_mode<synchronous>, transform_indices = @transform_1, window_bounds = array<i64: 128, 128>}, {pipeline_mode = #tpu.pipeline_mode<synchronous>, transform_indices = @transform_2, window_bounds = array<i64: 1, 128>}, {pipeline_mode = #tpu.pipeline_mode<synchronous>, transform_indices = @transform_3, window_bounds = array<i64: 128, 128>}, {pipeline_mode = #tpu.pipeline_mode<synchronous>, transform_indices = @transform_4, window_bounds = array<i64: 1, 128>}, {pipeline_mode = #tpu.pipeline_mode<synchronous>, transform_indices = @transform_5, window_bounds = array<i64: 128, 128>}, {pipeline_mode = #tpu.pipeline_mode<synchronous>, transform_indices = @transform_6, window_bounds = array<i64: 1, 128>}, {transform_indices = @transform_7, window_bounds = array<i64: 8, 128>}]} {
    %c0 = arith.constant 0 : index
    %c0_0 = arith.constant 0 : index
    %0 = vector.load %arg1[%c0, %c0_0] : memref<8x128xf32, #tpu.memory_space<vmem>>, vector<8x128xf32>
    %c0_1 = arith.constant 0 : index
    %c0_2 = arith.constant 0 : index
    %1 = vector.load %arg2[%c0_1, %c0_2] : memref<128x128xf32, #tpu.memory_space<vmem>>, vector<128x128xf32>
    %cst = arith.constant dense<0.000000e+00> : vector<8x128xf32>
    %2 = tpu.matmul %0, %1, %cst {dimension_numbers = #tpu.dot_dimension_numbers<[1], [0], [0], [1], [0, 0, 1, 1], [], []>} : vector<8x128xf32>, vector<128x128xf32>, vector<8x128xf32> -> vector<8x128xf32>
    %c0_3 = arith.constant 0 : index
    %c0_4 = arith.constant 0 : index
    %3 = vector.load %arg3[%c0_3, %c0_4] : memref<1x128xf32, #tpu.memory_space<vmem>>, vector<1x128xf32>
    %4 = vector.broadcast %3 : vector<1x128xf32> to vector<8x128xf32>
    %5 = arith.addf %2, %4 : vector<8x128xf32>
    %cst_5 = arith.constant 0.000000e+00 : f32
    %6 = vector.broadcast %cst_5 : f32 to vector<8x128xf32>
    %7 = arith.cmpf ogt, %5, %6 : vector<8x128xf32>
    %cst_6 = arith.constant 0.00999999977 : f32
    %8 = vector.broadcast %cst_6 : f32 to vector<8x128xf32>
    %9 = arith.mulf %8, %5 : vector<8x128xf32>
    %10 = arith.select %7, %5, %9 : vector<8x128xi1>, vector<8x128xf32>
    %c0_7 = arith.constant 0 : index
    %c0_8 = arith.constant 0 : index
    %11 = vector.load %arg4[%c0_7, %c0_8] : memref<128x128xf32, #tpu.memory_space<vmem>>, vector<128x128xf32>
    %cst_9 = arith.constant dense<0.000000e+00> : vector<8x128xf32>
    %12 = tpu.matmul %10, %11, %cst_9 {dimension_numbers = #tpu.dot_dimension_numbers<[1], [0], [0], [1], [0, 0, 1, 1], [], []>} : vector<8x128xf32>, vector<128x128xf32>, vector<8x128xf32> -> vector<8x128xf32>
    %c0_10 = arith.constant 0 : index
    %c0_11 = arith.constant 0 : index
    %13 = vector.load %arg5[%c0_10, %c0_11] : memref<1x128xf32, #tpu.memory_space<vmem>>, vector<1x128xf32>
    %14 = vector.broadcast %13 : vector<1x128xf32> to vector<8x128xf32>
    %15 = arith.addf %12, %14 : vector<8x128xf32>
    %cst_12 = arith.constant 0.000000e+00 : f32
    %16 = vector.broadcast %cst_12 : f32 to vector<8x128xf32>
    %17 = arith.cmpf ogt, %15, %16 : vector<8x128xf32>
    %cst_13 = arith.constant 0.00999999977 : f32
    %18 = vector.broadcast %cst_13 : f32 to vector<8x128xf32>
    %19 = arith.mulf %18, %15 : vector<8x128xf32>
    %20 = arith.select %17, %15, %19 : vector<8x128xi1>, vector<8x128xf32>
    %c0_14 = arith.constant 0 : index
    %c0_15 = arith.constant 0 : index
    %21 = vector.load %arg6[%c0_14, %c0_15] : memref<128x128xf32, #tpu.memory_space<vmem>>, vector<128x128xf32>
    %cst_16 = arith.constant dense<0.000000e+00> : vector<8x128xf32>
    %22 = tpu.matmul %20, %21, %cst_16 {dimension_numbers = #tpu.dot_dimension_numbers<[1], [0], [0], [1], [0, 0, 1, 1], [], []>} : vector<8x128xf32>, vector<128x128xf32>, vector<8x128xf32> -> vector<8x128xf32>
    %c0_17 = arith.constant 0 : index
    %c0_18 = arith.constant 0 : index
    %23 = vector.load %arg7[%c0_17, %c0_18] : memref<1x128xf32, #tpu.memory_space<vmem>>, vector<1x128xf32>
    %24 = vector.broadcast %23 : vector<1x128xf32> to vector<8x128xf32>
    %25 = arith.addf %22, %24 : vector<8x128xf32>
    %c0_19 = arith.constant 0 : index
    %c0_20 = arith.constant 0 : index
    %26 = vector.load %arg8[%c0_19, %c0_20] : memref<8x128xf32, #tpu.memory_space<vmem>>, vector<8x128xf32>
    tpu.vector_store %arg8[%c0_19, %c0_20], %25 {strides = array<i32>} : memref<8x128xf32, #tpu.memory_space<vmem>>, vector<8x128xf32>,
    return
  }
  func.func @transform_0(%arg0: i32) -> (i32, i32) {
    %c0_i32 = arith.constant 0 : i32
    %c0_i32_0 = arith.constant 0 : i32
    return %arg0, %c0_i32 : i32, i32
  }
  func.func @transform_1(%arg0: i32) -> (i32, i32) {
    %c0_i32 = arith.constant 0 : i32
    %c0_i32_0 = arith.constant 0 : i32
    %c0_i32_1 = arith.constant 0 : i32
    return %c0_i32, %c0_i32_0 : i32, i32
  }
  func.func @transform_2(%arg0: i32) -> (i32, i32) {
    %c0_i32 = arith.constant 0 : i32
    %c0_i32_0 = arith.constant 0 : i32
    %c0_i32_1 = arith.constant 0 : i32
    return %c0_i32, %c0_i32_0 : i32, i32
  }
  func.func @transform_3(%arg0: i32) -> (i32, i32) {
    %c0_i32 = arith.constant 0 : i32
    %c0_i32_0 = arith.constant 0 : i32
    %c0_i32_1 = arith.constant 0 : i32
    return %c0_i32, %c0_i32_0 : i32, i32
  }
  func.func @transform_4(%arg0: i32) -> (i32, i32) {
    %c0_i32 = arith.constant 0 : i32
    %c0_i32_0 = arith.constant 0 : i32
    %c0_i32_1 = arith.constant 0 : i32
    return %c0_i32, %c0_i32_0 : i32, i32
  }
  func.func @transform_5(%arg0: i32) -> (i32, i32) {
    %c0_i32 = arith.constant 0 : i32
    %c0_i32_0 = arith.constant 0 : i32
    %c0_i32_1 = arith.constant 0 : i32
    return %c0_i32, %c0_i32_0 : i32, i32
  }
  func.func @transform_6(%arg0: i32) -> (i32, i32) {
    %c0_i32 = arith.constant 0 : i32
    %c0_i32_0 = arith.constant 0 : i32
    %c0_i32_1 = arith.constant 0 : i32
    return %c0_i32, %c0_i32_0 : i32, i32
  }
  func.func @transform_7(%arg0: i32) -> (i32, i32) {
    %c0_i32 = arith.constant 0 : i32
    %c0_i32_0 = arith.constant 0 : i32
    return %arg0, %c0_i32 : i32, i32
  }
}

</mosaic_0001>

<bundles_post_ra>
// kernel: mlp_forward.1
= control target key start
LH: loop header
LB: loop body
LE: loop exit
PB: predicated region body
PF: predicated region fallthrough
CT: control target
= control target key end

     0   :  { %v587_v3 = vmov 0.0|0.0   ;;  %vm588_vm0 = vmmov 0   ;;  %v589_v6 = vmov 0.0   ;;  %s829_s0 = inlined_call_operand.vmem [shape: f32[8,128], index: 0, kind: input, shape index: {}]   ;;  %s830_s1 = inlined_call_operand.vmem [shape: f32[128,128], index: 1, kind: input, shape index: {}]   ;;  %s831_s2 = inlined_call_operand.vmem [shape: f32[1,128], index: 2, kind: input, shape index: {}]   ;;  %s832_s3 = inlined_call_operand.vmem [shape: f32[128,128], index: 3, kind: input, shape index: {}]   ;;  %s833_s4 = inlined_call_operand.vmem [shape: f32[1,128], index: 4, kind: input, shape index: {}]   ;;  %s834_s5 = inlined_call_operand.vmem [shape: f32[128,128], index: 5, kind: input, shape index: {}]   ;;  %s835_s6 = inlined_call_operand.vmem [shape: f32[1,128], index: 6, kind: input, shape index: {}]   ;;  %s836_s7 = inlined_call_operand.hbm [shape: f32[8,128], index: 7, kind: output, shape index: {}]  }
   0x1   :  { %v28_v0 = vld [vmem:[%s830_s1] sm:$0xff]  ;;  %v29_v1 = vld [vmem:[%s830_s1 + $0x8] sm:$0xff]  ;;  %v30_v2 = vld [vmem:[%s830_s1 + $0x10] sm:$0xff]  ;;  %487 = vmatprep.subr.bf16.mxu0 %v587_v3  ;;  %414 = vmatprep.mubr.msk.f32.mxu0 %vm588_vm0, %v589_v6 }
   0x2   :  { %v488_v4 = vpack.c.bf16 %v29_v1, %v28_v0  ;;  %v31_v5 = vld [vmem:[%s830_s1 + $0x18] sm:$0xff]  ;;  %511 = vmatprep.subr.bf16.mxu1 %v587_v3  ;;  %449 = vmatprep.mubr.msk.f32.mxu1 %vm588_vm0, %v589_v6  ;;  %v32_v8 = vld [vmem:[%s830_s1 + $0x20] sm:$0xff]  ;;  %v33_v9 = vld [vmem:[%s830_s1 + $0x28] sm:$0xff] }
   0x3   :  { %v491_v7 = vpack.c.bf16 %v31_v5, %v30_v2  ;;  %v124_v10 = vld [vmem:[%s832_s3] sm:$0xff]  ;;  %v125_v11 = vld [vmem:[%s832_s3 + $0x8] sm:$0xff]  ;;  %v126_v12 = vld [vmem:[%s832_s3 + $0x10] sm:$0xff]  ;;  %v494_v14 = vpack.c.bf16 %v33_v9, %v32_v8 }
   0x4   :  { %489 = vmatpush3.bf16.msra.mxu0 %v488_v4  ;;  %v127_v13 = vld [vmem:[%s832_s3 + $0x18] sm:$0xff]  ;;  %v512_v15 = vpack.c.bf16 %v125_v11, %v124_v10  ;;  %v34_v16 = vld [vmem:[%s830_s1 + $0x30] sm:$0xff]  ;;  %v128_v19 = vld [vmem:[%s832_s3 + $0x20] sm:$0xff] }
   0x5   :  { %490 = vmatprep.subr.bf16.mxu0 %v587_v3  ;;  %v35_v17 = vld [vmem:[%s830_s1 + $0x38] sm:$0xff]  ;;  %v515_v18 = vpack.c.bf16 %v127_v13, %v126_v12  ;;  %v129_v20 = vld [vmem:[%s832_s3 + $0x28] sm:$0xff] }
   0x6   :  { %513 = vmatpush3.bf16.msra.mxu1 %v512_v15 }
   0x7   :  { %514 = vmatprep.subr.bf16.mxu1 %v587_v3 }
   0x8   :  { %492 = vmatpush3.bf16.msra.mxu0 %v491_v7 }
   0x9   :  { %493 = vmatprep.subr.bf16.mxu0 %v587_v3 }
   0xa   :  { %12 = vsyncpa [#allocation3], 0  ;;  %v497_v21 = vpack.c.bf16 %v35_v17, %v34_v16  ;;  %v36_v22 = vld [vmem:[%s830_s1 + $0x40] sm:$0xff]  ;;  %v37_v23 = vld [vmem:[%s830_s1 + $0x48] sm:$0xff]  ;;  %516 = vmatpush3.bf16.msra.mxu1 %v515_v18  ;;  %v518_v24 = vpack.c.bf16 %v129_v20, %v128_v19  ;;  %s590_s29 = smov [#allocation2]  }
   0xb   :  { %517 = vmatprep.subr.bf16.mxu1 %v587_v3  ;;  %v130_v25 = vld [vmem:[%s832_s3 + $0x30] sm:$0xff]  ;;  %v131_v26 = vld [vmem:[%s832_s3 + $0x38] sm:$0xff]  ;;  %v500_v27 = vpack.c.bf16 %v37_v23, %v36_v22  ;;  %v132_v31 = vld [vmem:[%s832_s3 + $0x40] sm:$0xff]  ;;  %s320_s30 = sshll.u32 %s590_s29, 4  ;;  %s321_s30 = int_to_ptr.vmem [resolvable:$true] %s320_s30 }
   0xc   :  { %495 = vmatpush3.bf16.msra.mxu0 %v494_v14  ;;  %v38_v28 = vld [vmem:[%s830_s1 + $0x50] sm:$0xff]  ;;  %v39_v29 = vld [vmem:[%s830_s1 + $0x58] sm:$0xff]  ;;  %v521_v30 = vpack.c.bf16 %v131_v26, %v130_v25  ;;  %v133_v32 = vld [vmem:[%s832_s3 + $0x48] sm:$0xff]  ;;  %p568_p1 = scmp.lt.s32.totalorder %s321_s30, %s321_s30 }
   0xd   :  { %496 = vmatprep.subr.bf16.mxu0 %v587_v3  ;;  %v503_v33 = vpack.c.bf16 %v39_v29, %v38_v28  ;;  %v40_v34 = vld [vmem:[%s830_s1 + $0x60] sm:$0xff]  ;;  %v41_v35 = vld [vmem:[%s830_s1 + $0x68] sm:$0xff]  ;;  %v524_v36 = vpack.c.bf16 %v133_v32, %v132_v31  ;;  %v134_v37 = vld [vmem:[%s832_s3 + $0x50] sm:$0xff] }
   0xe   :  { %519 = vmatpush3.bf16.msra.mxu1 %v518_v24  ;;  %v135_v38 = vld [vmem:[%s832_s3 + $0x58] sm:$0xff]  ;;  %v506_v39 = vpack.c.bf16 %v41_v35, %v40_v34  ;;  %v42_v40 = vld [vmem:[%s830_s1 + $0x70] sm:$0xff]  ;;  %v136_v43 = vld [vmem:[%s832_s3 + $0x60] sm:$0xff] }
   0xf   :  { %520 = vmatprep.subr.bf16.mxu1 %v587_v3  ;;  %v43_v41 = vld [vmem:[%s830_s1 + $0x78] sm:$0xff]  ;;  %v527_v42 = vpack.c.bf16 %v135_v38, %v134_v37  ;;  %v137_v44 = vld [vmem:[%s832_s3 + $0x68] sm:$0xff]  ;;  %v27_v47 = vld [vmem:[%s829_s0] sm:$0xff] }
  0x10   :  { %498 = vmatpush3.bf16.msra.mxu0 %v497_v21  ;;  %v509_v45 = vpack.c.bf16 %v43_v41, %v42_v40  ;;  %v530_v46 = vpack.c.bf16 %v137_v44, %v136_v43  ;;  %v138_v48 = vld [vmem:[%s832_s3 + $0x70] sm:$0xff]  ;;  %v139_v49 = vld [vmem:[%s832_s3 + $0x78] sm:$0xff]  ;;  %v220_v51 = vld [vmem:[%s834_s5] sm:$0xff] }
  0x11   :  { %499 = vmatprep.subr.bf16.mxu0 %v587_v3  ;;  %v533_v50 = vpack.c.bf16 %v139_v49, %v138_v48  ;;  %v221_v52 = vld [vmem:[%s834_s5 + $0x8] sm:$0xff]  ;;  %v222_v53 = vld [vmem:[%s834_s5 + $0x10] sm:$0xff]  ;;  %v223_v55 = vld [vmem:[%s834_s5 + $0x18] sm:$0xff] }
  0x12   :  { %522 = vmatpush3.bf16.msra.mxu1 %v521_v30  ;;  %v536_v54 = vpack.c.bf16 %v221_v52, %v220_v51  ;;  %v539_v56 = vpack.c.bf16 %v223_v55, %v222_v53  ;;  %v224_v57 = vld [vmem:[%s834_s5 + $0x20] sm:$0xff]  ;;  %v225_v58 = vld [vmem:[%s834_s5 + $0x28] sm:$0xff]  ;;  %v226_v60 = vld [vmem:[%s834_s5 + $0x30] sm:$0xff] }
  0x13   :  { %523 = vmatprep.subr.bf16.mxu1 %v587_v3  ;;  %v542_v59 = vpack.c.bf16 %v225_v58, %v224_v57  ;;  %v227_v61 = vld [vmem:[%s834_s5 + $0x38] sm:$0xff]  ;;  %v228_v63 = vld [vmem:[%s834_s5 + $0x40] sm:$0xff]  ;;  %v229_v0 = vld [vmem:[%s834_s5 + $0x48] sm:$0xff] }
  0x14   :  { %501 = vmatpush3.bf16.msra.mxu0 %v500_v27  ;;  %v545_v62 = vpack.c.bf16 %v227_v61, %v226_v60  ;;  %v548_v1 = vpack.c.bf16 %v229_v0, %v228_v63  ;;  %v230_v2 = vld [vmem:[%s834_s5 + $0x50] sm:$0xff]  ;;  %v231_v4 = vld [vmem:[%s834_s5 + $0x58] sm:$0xff]  ;;  %v233_v7 = vld [vmem:[%s834_s5 + $0x68] sm:$0xff] }
  0x15   :  { %502 = vmatprep.subr.bf16.mxu0 %v587_v3  ;;  %v551_v5 = vpack.c.bf16 %v231_v4, %v230_v2  ;;  %v328_v9 = vld [vmem:[%s831_s2] ss:$0 sm:$0xff]  ;;  %v234_v15 = vld [vmem:[%s834_s5 + $0x70] sm:$0xff]  ;;  %v235_v16 = vld [vmem:[%s834_s5 + $0x78] sm:$0xff] }
  0x16   :  { %525 = vmatpush3.bf16.msra.mxu1 %v524_v36  ;;  %v329_v17 = vld [vmem:[%s833_s4] ss:$0 sm:$0xff] }
  0x17   :  { %526 = vmatprep.subr.bf16.mxu1 %v587_v3  ;;  %v330_v23 = vld [vmem:[%s835_s6] ss:$0 sm:$0xff] }
  0x18   :  { %504 = vmatpush3.bf16.msra.mxu0 %v503_v33 }
  0x19   :  { %505 = vmatprep.subr.bf16.mxu0 %v587_v3 }
  0x1a   :  { %528 = vmatpush3.bf16.msra.mxu1 %v527_v42 }
  0x1b   :  { %529 = vmatprep.subr.bf16.mxu1 %v587_v3 }
  0x1c   :  { %507 = vmatpush3.bf16.msra.mxu0 %v506_v39 }
  0x1d   :  { %508 = vmatprep.subr.bf16.mxu0 %v587_v3 }
  0x1e   :  { %531 = vmatpush3.bf16.msra.mxu1 %v530_v46 }
  0x1f   :  { %532 = vmatprep.subr.bf16.mxu1 %v587_v3 }
  0x20   :  { %510 = vmatpush3.bf16.msra.mxu0 %v509_v45 }
  0x21   :  { %535 = vmatprep.subr.bf16.mxu0 %v587_v3 }
  0x22   :  { %534 = vmatpush3.bf16.msra.mxu1 %v533_v50 }
  0x23   :  { %415 = vmatmul.mubr.f32.vlgmr.msra.gmra.mrb[0].mxu0 %v27_v47 }
  0x24   :  { %484 = vmatprep.mubr.msk.f32.mxu0 %vm588_vm0, %v589_v6  ;;  %537 = vmatpush3.bf16.msra.mxu0 %v536_v54  ;;  %v232_v6 = vld [vmem:[%s834_s5 + $0x60] sm:$0xff]  ;;  %s563_s5 = scalar_lea.vmem %s321_s30, 128 }
  0x25   :  { %538 = vmatprep.subr.bf16.mxu0 %v587_v3  ;;  %v554_v8 = vpack.c.bf16 %v233_v7, %v232_v6  ;;  %p564_p0 = scmp.ne.s32.totalorder %s321_s30, %s563_s5  ;;  %p569_p2 = scmp.lt.s32.totalorder %s563_s5, %s563_s5 }
  0x27   :  { %p570_p3 = por %p569_p2, %p568_p1 }
  0x28   :  { %540 = vmatpush3.bf16.msra.mxu0 %v539_v56 }
  0x29   :  { %541 = vmatprep.subr.bf16.mxu0 %v587_v3  ;;  %p571_p4 = pnand %p570_p3, %p564_p0 }
  0x2c   :  { %543 = vmatpush3.bf16.msra.mxu0 %v542_v59 }
  0x2d   :  { %544 = vmatprep.subr.bf16.mxu0 %v587_v3 }
  0x30   :  { %546 = vmatpush3.bf16.msra.mxu0 %v545_v62 }
  0x31   :  { %547 = vmatprep.subr.bf16.mxu0 %v587_v3 }
  0x34   :  { %549 = vmatpush3.bf16.msra.mxu0 %v548_v1 }
  0x35   :  { %550 = vmatprep.subr.bf16.mxu0 %v587_v3 }
  0x38   :  { %552 = vmatpush3.bf16.msra.mxu0 %v551_v5 }
  0x39   :  { %553 = vmatprep.subr.bf16.mxu0 %v587_v3 }
  0x3c   :  { %555 = vmatpush3.bf16.msra.mxu0 %v554_v8 }
  0x3d   :  { %556 = vmatprep.subr.bf16.mxu0 %v587_v3  ;;  %v557_v3 = vpack.c.bf16 %v235_v16, %v234_v15 }
  0x40   :  { %558 = vmatpush3.bf16.msra.mxu0 %v557_v3 }
  0xf6   :  { %v117_v10 = vpop.f32.mrb[0].mxu0 }
  0xf7   :  { %v118_v11 = vadd.f32 %v328_v9, %v117_v10  ;;  %v416_v12 = vpop.f32.mrb[1].mxu0 }
  0xf9   :  { %v122_v13 = vmul.f32 0.01, %v118_v11  ;;  %vm121_vm1 = vcmp.gt.f32.partialorder %v118_v11, 0.0 }
  0xfb   :  { %v123_v14 = vsel %vm121_vm1, %v118_v11, %v122_v13 }
  0xfc   :  { %450 = vmatmul.mubr.f32.vlgmr.msra.gmra.mrb[0].mxu1 %v123_v14 }
 0x1cf   :  { %v213_v18 = vpop.f32.mrb[0].mxu1 }
 0x1d0   :  { %v214_v19 = vadd.f32 %v329_v17, %v213_v18  ;;  %v451_v20 = vpop.f32.mrb[1].mxu1 }
 0x1d2   :  { %vm217_vm2 = vcmp.gt.f32.partialorder %v214_v19, 0.0  ;;  %v218_v21 = vmul.f32 0.01, %v214_v19 }
 0x1d4   :  { %v219_v22 = vsel %vm217_vm2, %v214_v19, %v218_v21 }
 0x1d5   :  { %485 = vmatmul.mubr.f32.vlgmr.msra.gmra.mrb[2].mxu0 %v219_v22 }
 0x2a8   :  { %v309_v24 = vpop.f32.mrb[2].mxu0 }
 0x2a9   :  { %v310_v25 = vadd.f32 %v330_v23, %v309_v24  ;;  %v486_v26 = vpop.f32.mrb[3].mxu0 }
 0x2ab   :  { %313 = vst [vmem:[#allocation2] sm:$0xff] %v310_v25 }
 0x2ac   :  { %574 = shalt.err (!%p571_p4)
}
 0x2ad   :  { %s575_s9 = scalar_lea.hbm %s836_s7, 128 }
 0x2ae   :  { %p576_p5 = scmp.ne.s32.totalorder %s836_s7, %s575_s9  ;;  %p579_p6 = scmp.lt.u32.totalorder %s575_s9, %s836_s7 }
 0x2b0   :  { %p581_p7 = pnand %p579_p6, %p576_p5 }
 0x2b2   :  { %584 = shalt.err (!%p581_p7)
}
 0x2b3   :  { %323 = dma.vmem_to_hbm [thread:$0]  %s321_s30, 128, %s836_s7, [#allocation3]  }
 0x2b4   :  { %585 = dma.done.wait [#allocation3], 128  }
 0x2b5   :  { %586 = vsyncadd [#allocation3], 4294967168 }
 0x2b6   :  { %327 = vsyncpa [#allocation3], 1 }

</bundles_post_ra>
